<compile_context>
chip_gen: v6e
topology: v6e:2x2x1
jax: 0.10.0
libtpu: 0.0.40
codegen_flags: <defaults>
</compile_context>

<pallas_src>
import jax
import jax.numpy as jnp
from jax.experimental import pallas as pl
from jax.experimental.pallas import tpu as pltpu

_VMEM_LIMIT = 32 * 1024 * 1024   # safe scoped-VMEM cap on v5e / v6e / v7x


def _round_up(x, m):
    return ((x + m - 1) // m) * m


def _tile_rows(R, max_tile=256, min_grid=2):
    """Row-axis (lane) tiling: tiles are multiples of 128, R padded to fit.

    Tries to give the grid at least `min_grid` steps (v7x has 2 TensorCores) while
    keeping tiles <= max_tile so the fused kernel's (Cout, 4*TR) matmul result
    stays small (no vreg spills)."""
    Rpad = max(128, _round_up(R, 128))
    n128 = Rpad // 128
    n_tiles = min(max(min_grid, -(-Rpad // max_tile)), n128)
    TR = (-(-n128 // n_tiles)) * 128
    n_tiles = -(-Rpad // TR)
    return TR, n_tiles * TR


# ----------------------------------------------------------------------------
# Pallas kernels
# ----------------------------------------------------------------------------
def _conv_pool_attn_kernel(p_ref, wc_ref, b_ref, w1_ref, w2_ref, o_ref):
    """Fused conv + bias + ReLU + MaxPool(2,2) + AttentionBlock gate.

    p:  (K, 4*TR) bf16   im2col patches, 4 lane-aligned pooling-tap chunks
    wc: (Cout, K) bf16   conv weight;  b: (Cout, 1) f32 conv bias
    w1: (Cmid, Cout) bf16, w2: (Cmid, 1) f32   attention 1x1 convs (no bias)
    out = x * sigmoid(w2^T relu(w1 @ x)),  x = relu(max_tap(wc @ p_tap) + b)
    """
    TR = o_ref.shape[-1]
    # one MXU pass over all 4 pooling taps (single weight push, long N stream)
    y4 = jnp.dot(wc_ref[...], p_ref[...], preferred_element_type=jnp.float32)
    # tap max: lane-aligned (TR is a multiple of 128) -> pure VPU work
    y = jnp.maximum(jnp.maximum(y4[:, 0 * TR:1 * TR], y4[:, 1 * TR:2 * TR]),
                    jnp.maximum(y4[:, 2 * TR:3 * TR], y4[:, 3 * TR:4 * TR]))
    y = jnp.maximum(y + b_ref[...], 0.0)                       # bias + ReLU (f32)
    # attention gate (per-column 1x1 convs); second conv (K x 1) is a VPU reduce
    a = jnp.maximum(jnp.dot(w1_ref[...], y.astype(jnp.bfloat16),
                            preferred_element_type=jnp.float32), 0.0)
    g = jax.nn.sigmoid(jnp.sum(a * w2_ref[...], axis=0, keepdims=True))
    o_ref[...] = (y * g).astype(o_ref.dtype)


def _fc_kernel(x_ref, w_ref, b_ref, o_ref, acc_ref):
    """Streamed linear layer: accumulate over the F (reduction) grid axis."""
    k = pl.program_id(0)

    @pl.when(k == 0)
    def _():
        acc_ref[...] = jnp.zeros_like(acc_ref)

    acc_ref[...] += jnp.dot(x_ref[...], w_ref[...],
                            preferred_element_type=jnp.float32)

    @pl.when(k == pl.num_programs(0) - 1)
    def _():
        o_ref[...] = (acc_ref[...] + b_ref[...]).astype(o_ref.dtype)


# ----------------------------------------------------------------------------
# Pallas wrappers
# ----------------------------------------------------------------------------
def conv_pool_attn(patches, wc, b, w1, w2, *, max_tile=256,
                   out_dtype=jnp.bfloat16):
    """Fused conv+ReLU+maxpool+attention.  patches:(4,K,R), wc:(Cout,K), b:(Cout,),
    w1:(Cmid,Cout), w2:(Cmid,1) -> gated pooled activation (Cout, R)."""
    _, K, R = patches.shape
    Cout = wc.shape[0]
    Cmid = w1.shape[0]
    TR, Rpad = _tile_rows(R, max_tile)
    n_tiles = Rpad // TR

    p = patches.astype(jnp.bfloat16)
    if Rpad != R:
        p = jnp.pad(p, ((0, 0), (0, 0), (0, Rpad - R)))
    # per-row-tile layout (n_tiles, K, 4*TR): tap chunks are lane-aligned in a tile
    p = p.reshape(4, K, n_tiles, TR).transpose(2, 1, 0, 3).reshape(n_tiles, K, 4 * TR)

    out = pl.pallas_call(
        _conv_pool_attn_kernel,
        out_shape=jax.ShapeDtypeStruct((Cout, Rpad), out_dtype),
        grid=(n_tiles,),
        in_specs=[
            pl.BlockSpec((None, K, 4 * TR), lambda i: (i, 0, 0)),
            pl.BlockSpec((Cout, K), lambda i: (0, 0)),     # constant -> DMA'd once
            pl.BlockSpec((Cout, 1), lambda i: (0, 0)),
            pl.BlockSpec((Cmid, Cout), lambda i: (0, 0)),
            pl.BlockSpec((Cmid, 1), lambda i: (0, 0)),
        ],
        out_specs=pl.BlockSpec((Cout, TR), lambda i: (0, i)),
        compiler_params=pltpu.CompilerParams(
            dimension_semantics=("parallel",),
            vmem_limit_bytes=_VMEM_LIMIT),
    )(p, wc.astype(jnp.bfloat16), b.reshape(Cout, 1).astype(jnp.float32),
      w1.astype(jnp.bfloat16), w2.reshape(Cmid, 1).astype(jnp.float32))
    return out[:, :R] if Rpad != R else out


def fc_layer(x, w, b, *, max_tk=512):
    """x:(B,F) @ w:(F,N) + b.  Weight streamed over a K-reduction grid axis; N
    padded to 128 lanes in-kernel and sliced back."""
    B, F = x.shape
    N = w.shape[1]
    Np = max(128, _round_up(N, 128))
    TK = min(max_tk, max(128, _round_up(F, 128)))
    Fpad = _round_up(F, TK)

    x = x.astype(jnp.bfloat16)
    w = w.astype(jnp.bfloat16)
    if Fpad != F:
        x = jnp.pad(x, ((0, 0), (0, Fpad - F)))
        w = jnp.pad(w, ((0, Fpad - F), (0, 0)))
    if Np != N:
        w = jnp.pad(w, ((0, 0), (0, Np - N)))
        b = jnp.pad(b, (0, Np - N))

    out = pl.pallas_call(
        _fc_kernel,
        out_shape=jax.ShapeDtypeStruct((B, Np), jnp.float32),
        grid=(Fpad // TK,),
        in_specs=[
            pl.BlockSpec((B, TK), lambda k: (0, k)),
            pl.BlockSpec((TK, Np), lambda k: (k, 0)),
            pl.BlockSpec((1, Np), lambda k: (0, 0)),
        ],
        out_specs=pl.BlockSpec((B, Np), lambda k: (0, 0)),
        scratch_shapes=[pltpu.VMEM((B, Np), jnp.float32)],
        compiler_params=pltpu.CompilerParams(
            dimension_semantics=("arbitrary",),
            vmem_limit_bytes=_VMEM_LIMIT),
    )(x, w, b.reshape(1, Np).astype(jnp.float32))
    return out[:, :N]


# ----------------------------------------------------------------------------
# Glue: per-pooling-tap im2col patches (strided slices / reshapes only)
# ----------------------------------------------------------------------------
def pool_conv_patches(x_cbhw, kh, kw, pad):
    """im2col patches for a stride-1 'same' conv fused with a 2x2/2 maxpool.

    x_cbhw: (Cin, B, H, W).  Returns (4, Cin*kh*kw, B*(H//2)*(W//2)); axis 0
    indexes the 4 pooling-window taps, and the K axis is ordered (cin, kh, kw)
    to match a PyTorch conv weight reshaped as (cout, cin*kh*kw)."""
    C, B, H, W = x_cbhw.shape
    Ho, Wo = H // 2, W // 2
    xp = jnp.pad(x_cbhw, ((0, 0), (0, 0), (pad, pad), (pad, pad)))
    taps = []
    for ph in range(2):
        for pw in range(2):
            rows = []
            for di in range(kh):
                for dj in range(kw):
                    rows.append(xp[:, :, ph + di: ph + di + H: 2,
                                       pw + dj: pw + dj + W: 2])  # (C, B, Ho, Wo)
            t = jnp.stack(rows, axis=1)                            # (C, kh*kw, B, Ho, Wo)
            taps.append(t.reshape(C * kh * kw, B * Ho * Wo))
    return jnp.stack(taps, axis=0)                                 # (4, K, Rpool)


# ----------------------------------------------------------------------------
# Parameters (deterministic synthetic init; shapes follow the nn.Module)
# ----------------------------------------------------------------------------
def init_params(key, H, M, output_dim):
    ks = jax.random.split(key, 10)

    def u(k, shape, fan_in):
        bound = 1.0 / jnp.sqrt(jnp.float32(fan_in))
        return jax.random.uniform(k, shape, jnp.float32, -bound, bound)

    fc_in = 32 * (H // 4) * (M // 4)
    return {
        # conv1: Conv2d(1, 16, 5, pad=2) -> weight as (cout, cin*kh*kw)
        "conv1_w": u(ks[0], (16, 1 * 5 * 5), 1 * 5 * 5),
        "conv1_b": u(ks[1], (16,), 1 * 5 * 5),
        # attention1: Conv2d(16, 8, 1, bias=False) as (8,16); Conv2d(8, 1, 1, bias=False) as (8,1)
        "att1_w1": u(ks[2], (8, 16), 16),
        "att1_w2": u(ks[3], (8, 1), 8),
        # conv2: Conv2d(16, 32, 3, pad=1)
        "conv2_w": u(ks[4], (32, 16 * 3 * 3), 16 * 3 * 3),
        "conv2_b": u(ks[5], (32,), 16 * 3 * 3),
        # attention2: Conv2d(32, 16, 1, bias=False); Conv2d(16, 1, 1, bias=False)
        "att2_w1": u(ks[6], (16, 32), 32),
        "att2_w2": u(ks[7], (16, 1), 16),
        # fc: Linear(32*(H//4)*(M//4), output_dim); stored (in, out) (transpose real ckpts)
        "fc_w": u(ks[8], (fc_in, output_dim), fc_in),
        "fc_b": u(ks[9], (output_dim,), fc_in),
    }


# ----------------------------------------------------------------------------
# Forward pass
# ----------------------------------------------------------------------------
def cnn_with_attention_forward(x_nchw, params):
    B, Cin, H, W = x_nchw.shape
    assert H % 4 == 0 and W % 4 == 0, "two MaxPool(2,2) stages assume H, W % 4 == 0"
    H2, W2 = H // 2, W // 2
    H4, W4 = H2 // 2, W2 // 2

    x = jnp.transpose(x_nchw, (1, 0, 2, 3)).astype(jnp.bfloat16)   # (Cin, B, H, W)

    # block 1: Conv2d(1,16,5,pad=2)+ReLU+MaxPool(2,2) + AttentionBlock(16,8) -- one kernel
    p1 = pool_conv_patches(x, 5, 5, 2)                              # (4, 25, B*H2*W2)
    y = conv_pool_attn(p1, params["conv1_w"], params["conv1_b"],
                       params["att1_w1"], params["att1_w2"])        # (16, B*H2*W2) bf16

    # block 2: Conv2d(16,32,3,pad=1)+ReLU+MaxPool(2,2) + AttentionBlock(32,16) -- one kernel
    p2 = pool_conv_patches(y.reshape(16, B, H2, W2), 3, 3, 1)       # (4, 144, B*H4*W4)
    y = conv_pool_attn(p2, params["conv2_w"], params["conv2_b"],
                       params["att2_w1"], params["att2_w2"])        # (32, B*H4*W4) bf16

    # flatten in PyTorch NCHW order (per batch: (c, h, w)), then fc
    feat = jnp.transpose(y.reshape(32, B, H4 * W4), (1, 0, 2)).reshape(B, 32 * H4 * W4)
    return fc_layer(feat, params["fc_w"], params["fc_b"])


# ----------------------------------------------------------------------------
# Main
# ----------------------------------------------------------------------------
if __name__ == "__main__":
    H, M, output_dim = 16, 16, 10
    B = 2

    key = jax.random.PRNGKey(0)
    kx, kp = jax.random.split(key)
    x = jax.random.normal(kx, (B, 1, H, M), dtype=jnp.float32)      # NCHW input
    params = init_params(kp, H, M, output_dim)

    fwd = jax.jit(cnn_with_attention_forward)
    out = jax.block_until_ready(fwd(x, params))

    assert out.shape == (B, output_dim), out.shape
    assert bool(jnp.all(jnp.isfinite(out)))
    print("KERNEL_OK")
</pallas_src>

<mosaic_0001>
module attributes {stable_mosaic.version = 11 : i64} {
  func.func @_conv_pool_attn_kernel(%arg0: i32, %arg1: memref<1x25x512xbf16, #tpu.memory_space<vmem>>, %arg2: memref<16x25xbf16, #tpu.memory_space<vmem>>, %arg3: memref<16x1xf32, #tpu.memory_space<vmem>>, %arg4: memref<8x16xbf16, #tpu.memory_space<vmem>>, %arg5: memref<8x1xf32, #tpu.memory_space<vmem>>, %arg6: memref<16x128xbf16, #tpu.memory_space<vmem>>) attributes {dimension_semantics = [#tpu.dimension_semantics<parallel>], iteration_bounds = array<i64: 1>, scalar_prefetch = 0 : i64, scratch_operands = 0 : i64, tpu.core_type = #tpu.core_type<tc>, window_params = [{transform_indices = @transform_0, window_bounds = array<i64: 1, 25, 512>}, {pipeline_mode = #tpu.pipeline_mode<synchronous>, transform_indices = @transform_1, window_bounds = array<i64: 16, 25>}, {pipeline_mode = #tpu.pipeline_mode<synchronous>, transform_indices = @transform_2, window_bounds = array<i64: 16, 1>}, {pipeline_mode = #tpu.pipeline_mode<synchronous>, transform_indices = @transform_3, window_bounds = array<i64: 8, 16>}, {pipeline_mode = #tpu.pipeline_mode<synchronous>, transform_indices = @transform_4, window_bounds = array<i64: 8, 1>}, {transform_indices = @transform_5, window_bounds = array<i64: 16, 128>}]} {
    %c0 = arith.constant 0 : index
    %c0_0 = arith.constant 0 : index
    %0 = vector.load %arg2[%c0, %c0_0] : memref<16x25xbf16, #tpu.memory_space<vmem>>, vector<16x25xbf16>
    %c0_1 = arith.constant 0 : index
    %c0_2 = arith.constant 0 : index
    %c0_3 = arith.constant 0 : index
    %1 = vector.load %arg1[%c0_1, %c0_2, %c0_3] : memref<1x25x512xbf16, #tpu.memory_space<vmem>>, vector<1x25x512xbf16>
    %2 = vector.shape_cast %1 : vector<1x25x512xbf16> to vector<25x512xbf16>
    %cst = arith.constant dense<0.000000e+00> : vector<16x512xf32>
    %3 = tpu.matmul %0, %2, %cst {dimension_numbers = #tpu.dot_dimension_numbers<[1], [0], [0], [1], [0, 0, 1, 1], [], []>} : vector<16x25xbf16>, vector<25x512xbf16>, vector<16x512xf32> -> vector<16x512xf32>
    %4 = vector.extract_strided_slice %3 {offsets = [0, 0], sizes = [16, 128], strides = [1, 1]} : vector<16x512xf32> to vector<16x128xf32>
    %5 = vector.extract_strided_slice %3 {offsets = [0, 128], sizes = [16, 128], strides = [1, 1]} : vector<16x512xf32> to vector<16x128xf32>
    %6 = arith.maximumf %4, %5 : vector<16x128xf32>
    %7 = vector.extract_strided_slice %3 {offsets = [0, 256], sizes = [16, 128], strides = [1, 1]} : vector<16x512xf32> to vector<16x128xf32>
    %8 = vector.extract_strided_slice %3 {offsets = [0, 384], sizes = [16, 128], strides = [1, 1]} : vector<16x512xf32> to vector<16x128xf32>
    %9 = arith.maximumf %7, %8 : vector<16x128xf32>
    %10 = arith.maximumf %6, %9 : vector<16x128xf32>
    %c0_4 = arith.constant 0 : index
    %c0_5 = arith.constant 0 : index
    %11 = vector.load %arg3[%c0_4, %c0_5] : memref<16x1xf32, #tpu.memory_space<vmem>>, vector<16x1xf32>
    %12 = vector.broadcast %11 : vector<16x1xf32> to vector<16x128xf32>
    %13 = arith.addf %10, %12 : vector<16x128xf32>
    %cst_6 = arith.constant 0.000000e+00 : f32
    %14 = vector.broadcast %cst_6 : f32 to vector<16x128xf32>
    %15 = arith.maximumf %13, %14 : vector<16x128xf32>
    %c0_7 = arith.constant 0 : index
    %c0_8 = arith.constant 0 : index
    %16 = vector.load %arg4[%c0_7, %c0_8] : memref<8x16xbf16, #tpu.memory_space<vmem>>, vector<8x16xbf16>
    %17 = arith.truncf %15 : vector<16x128xf32> to vector<16x128xbf16>
    %cst_9 = arith.constant dense<0.000000e+00> : vector<8x128xf32>
    %18 = tpu.matmul %16, %17, %cst_9 {dimension_numbers = #tpu.dot_dimension_numbers<[1], [0], [0], [1], [0, 0, 1, 1], [], []>} : vector<8x16xbf16>, vector<16x128xbf16>, vector<8x128xf32> -> vector<8x128xf32>
    %cst_10 = arith.constant 0.000000e+00 : f32
    %19 = vector.broadcast %cst_10 : f32 to vector<8x128xf32>
    %20 = arith.maximumf %18, %19 : vector<8x128xf32>
    %c0_11 = arith.constant 0 : index
    %c0_12 = arith.constant 0 : index
    %21 = vector.load %arg5[%c0_11, %c0_12] : memref<8x1xf32, #tpu.memory_space<vmem>>, vector<8x1xf32>
    %22 = vector.broadcast %21 : vector<8x1xf32> to vector<8x128xf32>
    %23 = arith.mulf %20, %22 : vector<8x128xf32>
    %cst_13 = arith.constant dense<0.000000e+00> : vector<128xf32>
    %24 = vector.multi_reduction <add>, %23, %cst_13 [0] : vector<8x128xf32> to vector<128xf32>
    %25 = vector.shape_cast %24 : vector<128xf32> to vector<1x128xf32>
    %26 = arith.negf %25 : vector<1x128xf32>
    %27 = math.exp %26 : vector<1x128xf32>
    %cst_14 = arith.constant 1.000000e+00 : f32
    %28 = vector.broadcast %cst_14 : f32 to vector<1x128xf32>
    %29 = arith.addf %28, %27 : vector<1x128xf32>
    %30 = arith.divf %28, %29 : vector<1x128xf32>
    %31 = vector.broadcast %30 : vector<1x128xf32> to vector<16x128xf32>
    %32 = arith.mulf %15, %31 : vector<16x128xf32>
    %33 = arith.truncf %32 : vector<16x128xf32> to vector<16x128xbf16>
    %c0_15 = arith.constant 0 : index
    %c0_16 = arith.constant 0 : index
    %34 = vector.load %arg6[%c0_15, %c0_16] : memref<16x128xbf16, #tpu.memory_space<vmem>>, vector<16x128xbf16>
    tpu.vector_store %arg6[%c0_15, %c0_16], %33 {strides = array<i32>} : memref<16x128xbf16, #tpu.memory_space<vmem>>, vector<16x128xbf16>,
    return
  }
  func.func @transform_0(%arg0: i32) -> (i32, i32, i32) {
    %c0_i32 = arith.constant 0 : i32
    %c0_i32_0 = arith.constant 0 : i32
    %c0_i32_1 = arith.constant 0 : i32
    return %arg0, %c0_i32, %c0_i32_0 : i32, i32, i32
  }
  func.func @transform_1(%arg0: i32) -> (i32, i32) {
    %c0_i32 = arith.constant 0 : i32
    %c0_i32_0 = arith.constant 0 : i32
    %c0_i32_1 = arith.constant 0 : i32
    return %c0_i32, %c0_i32_0 : i32, i32
  }
  func.func @transform_2(%arg0: i32) -> (i32, i32) {
    %c0_i32 = arith.constant 0 : i32
    %c0_i32_0 = arith.constant 0 : i32
    %c0_i32_1 = arith.constant 0 : i32
    return %c0_i32, %c0_i32_0 : i32, i32
  }
  func.func @transform_3(%arg0: i32) -> (i32, i32) {
    %c0_i32 = arith.constant 0 : i32
    %c0_i32_0 = arith.constant 0 : i32
    %c0_i32_1 = arith.constant 0 : i32
    return %c0_i32, %c0_i32_0 : i32, i32
  }
  func.func @transform_4(%arg0: i32) -> (i32, i32) {
    %c0_i32 = arith.constant 0 : i32
    %c0_i32_0 = arith.constant 0 : i32
    %c0_i32_1 = arith.constant 0 : i32
    return %c0_i32, %c0_i32_0 : i32, i32
  }
  func.func @transform_5(%arg0: i32) -> (i32, i32) {
    %c0_i32 = arith.constant 0 : i32
    %c0_i32_0 = arith.constant 0 : i32
    return %c0_i32, %arg0 : i32, i32
  }
}

module attributes {stable_mosaic.version = 11 : i64} {
  func.func @_conv_pool_attn_kernel(%arg0: i32, %arg1: memref<1x144x512xbf16, #tpu.memory_space<vmem>>, %arg2: memref<32x144xbf16, #tpu.memory_space<vmem>>, %arg3: memref<32x1xf32, #tpu.memory_space<vmem>>, %arg4: memref<16x32xbf16, #tpu.memory_space<vmem>>, %arg5: memref<16x1xf32, #tpu.memory_space<vmem>>, %arg6: memref<32x128xbf16, #tpu.memory_space<vmem>>) attributes {dimension_semantics = [#tpu.dimension_semantics<parallel>], iteration_bounds = array<i64: 1>, scalar_prefetch = 0 : i64, scratch_operands = 0 : i64, tpu.core_type = #tpu.core_type<tc>, window_params = [{transform_indices = @transform_0, window_bounds = array<i64: 1, 144, 512>}, {pipeline_mode = #tpu.pipeline_mode<synchronous>, transform_indices = @transform_1, window_bounds = array<i64: 32, 144>}, {pipeline_mode = #tpu.pipeline_mode<synchronous>, transform_indices = @transform_2, window_bounds = array<i64: 32, 1>}, {pipeline_mode = #tpu.pipeline_mode<synchronous>, transform_indices = @transform_3, window_bounds = array<i64: 16, 32>}, {pipeline_mode = #tpu.pipeline_mode<synchronous>, transform_indices = @transform_4, window_bounds = array<i64: 16, 1>}, {transform_indices = @transform_5, window_bounds = array<i64: 32, 128>}]} {
    %c0 = arith.constant 0 : index
    %c0_0 = arith.constant 0 : index
    %0 = vector.load %arg2[%c0, %c0_0] : memref<32x144xbf16, #tpu.memory_space<vmem>>, vector<32x144xbf16>
    %c0_1 = arith.constant 0 : index
    %c0_2 = arith.constant 0 : index
    %c0_3 = arith.constant 0 : index
    %1 = vector.load %arg1[%c0_1, %c0_2, %c0_3] : memref<1x144x512xbf16, #tpu.memory_space<vmem>>, vector<1x144x512xbf16>
    %2 = vector.shape_cast %1 : vector<1x144x512xbf16> to vector<144x512xbf16>
    %cst = arith.constant dense<0.000000e+00> : vector<32x512xf32>
    %3 = tpu.matmul %0, %2, %cst {dimension_numbers = #tpu.dot_dimension_numbers<[1], [0], [0], [1], [0, 0, 1, 1], [], []>} : vector<32x144xbf16>, vector<144x512xbf16>, vector<32x512xf32> -> vector<32x512xf32>
    %4 = vector.extract_strided_slice %3 {offsets = [0, 0], sizes = [32, 128], strides = [1, 1]} : vector<32x512xf32> to vector<32x128xf32>
    %5 = vector.extract_strided_slice %3 {offsets = [0, 128], sizes = [32, 128], strides = [1, 1]} : vector<32x512xf32> to vector<32x128xf32>
    %6 = arith.maximumf %4, %5 : vector<32x128xf32>
    %7 = vector.extract_strided_slice %3 {offsets = [0, 256], sizes = [32, 128], strides = [1, 1]} : vector<32x512xf32> to vector<32x128xf32>
    %8 = vector.extract_strided_slice %3 {offsets = [0, 384], sizes = [32, 128], strides = [1, 1]} : vector<32x512xf32> to vector<32x128xf32>
    %9 = arith.maximumf %7, %8 : vector<32x128xf32>
    %10 = arith.maximumf %6, %9 : vector<32x128xf32>
    %c0_4 = arith.constant 0 : index
    %c0_5 = arith.constant 0 : index
    %11 = vector.load %arg3[%c0_4, %c0_5] : memref<32x1xf32, #tpu.memory_space<vmem>>, vector<32x1xf32>
    %12 = vector.broadcast %11 : vector<32x1xf32> to vector<32x128xf32>
    %13 = arith.addf %10, %12 : vector<32x128xf32>
    %cst_6 = arith.constant 0.000000e+00 : f32
    %14 = vector.broadcast %cst_6 : f32 to vector<32x128xf32>
    %15 = arith.maximumf %13, %14 : vector<32x128xf32>
    %c0_7 = arith.constant 0 : index
    %c0_8 = arith.constant 0 : index
    %16 = vector.load %arg4[%c0_7, %c0_8] : memref<16x32xbf16, #tpu.memory_space<vmem>>, vector<16x32xbf16>
    %17 = arith.truncf %15 : vector<32x128xf32> to vector<32x128xbf16>
    %cst_9 = arith.constant dense<0.000000e+00> : vector<16x128xf32>
    %18 = tpu.matmul %16, %17, %cst_9 {dimension_numbers = #tpu.dot_dimension_numbers<[1], [0], [0], [1], [0, 0, 1, 1], [], []>} : vector<16x32xbf16>, vector<32x128xbf16>, vector<16x128xf32> -> vector<16x128xf32>
    %cst_10 = arith.constant 0.000000e+00 : f32
    %19 = vector.broadcast %cst_10 : f32 to vector<16x128xf32>
    %20 = arith.maximumf %18, %19 : vector<16x128xf32>
    %c0_11 = arith.constant 0 : index
    %c0_12 = arith.constant 0 : index
    %21 = vector.load %arg5[%c0_11, %c0_12] : memref<16x1xf32, #tpu.memory_space<vmem>>, vector<16x1xf32>
    %22 = vector.broadcast %21 : vector<16x1xf32> to vector<16x128xf32>
    %23 = arith.mulf %20, %22 : vector<16x128xf32>
    %cst_13 = arith.constant dense<0.000000e+00> : vector<128xf32>
    %24 = vector.multi_reduction <add>, %23, %cst_13 [0] : vector<16x128xf32> to vector<128xf32>
    %25 = vector.shape_cast %24 : vector<128xf32> to vector<1x128xf32>
    %26 = arith.negf %25 : vector<1x128xf32>
    %27 = math.exp %26 : vector<1x128xf32>
    %cst_14 = arith.constant 1.000000e+00 : f32
    %28 = vector.broadcast %cst_14 : f32 to vector<1x128xf32>
    %29 = arith.addf %28, %27 : vector<1x128xf32>
    %30 = arith.divf %28, %29 : vector<1x128xf32>
    %31 = vector.broadcast %30 : vector<1x128xf32> to vector<32x128xf32>
    %32 = arith.mulf %15, %31 : vector<32x128xf32>
    %33 = arith.truncf %32 : vector<32x128xf32> to vector<32x128xbf16>
    %c0_15 = arith.constant 0 : index
    %c0_16 = arith.constant 0 : index
    %34 = vector.load %arg6[%c0_15, %c0_16] : memref<32x128xbf16, #tpu.memory_space<vmem>>, vector<32x128xbf16>
    tpu.vector_store %arg6[%c0_15, %c0_16], %33 {strides = array<i32>} : memref<32x128xbf16, #tpu.memory_space<vmem>>, vector<32x128xbf16>,
    return
  }
  func.func @transform_0(%arg0: i32) -> (i32, i32, i32) {
    %c0_i32 = arith.constant 0 : i32
    %c0_i32_0 = arith.constant 0 : i32
    %c0_i32_1 = arith.constant 0 : i32
    return %arg0, %c0_i32, %c0_i32_0 : i32, i32, i32
  }
  func.func @transform_1(%arg0: i32) -> (i32, i32) {
    %c0_i32 = arith.constant 0 : i32
    %c0_i32_0 = arith.constant 0 : i32
    %c0_i32_1 = arith.constant 0 : i32
    return %c0_i32, %c0_i32_0 : i32, i32
  }
  func.func @transform_2(%arg0: i32) -> (i32, i32) {
    %c0_i32 = arith.constant 0 : i32
    %c0_i32_0 = arith.constant 0 : i32
    %c0_i32_1 = arith.constant 0 : i32
    return %c0_i32, %c0_i32_0 : i32, i32
  }
  func.func @transform_3(%arg0: i32) -> (i32, i32) {
    %c0_i32 = arith.constant 0 : i32
    %c0_i32_0 = arith.constant 0 : i32
    %c0_i32_1 = arith.constant 0 : i32
    return %c0_i32, %c0_i32_0 : i32, i32
  }
  func.func @transform_4(%arg0: i32) -> (i32, i32) {
    %c0_i32 = arith.constant 0 : i32
    %c0_i32_0 = arith.constant 0 : i32
    %c0_i32_1 = arith.constant 0 : i32
    return %c0_i32, %c0_i32_0 : i32, i32
  }
  func.func @transform_5(%arg0: i32) -> (i32, i32) {
    %c0_i32 = arith.constant 0 : i32
    %c0_i32_0 = arith.constant 0 : i32
    return %c0_i32, %arg0 : i32, i32
  }
}

module attributes {stable_mosaic.version = 11 : i64} {
  func.func @_fc_kernel(%arg0: i32, %arg1: memref<2x512xbf16, #tpu.memory_space<vmem>>, %arg2: memref<512x128xbf16, #tpu.memory_space<vmem>>, %arg3: memref<1x128xf32, #tpu.memory_space<vmem>>, %arg4: memref<2x128xf32, #tpu.memory_space<vmem>>, %arg5: memref<2x128xf32, #tpu.memory_space<vmem>>) attributes {dimension_semantics = [#tpu.dimension_semantics<arbitrary>], iteration_bounds = array<i64: 1>, scalar_prefetch = 0 : i64, scratch_operands = 1 : i64, tpu.core_type = #tpu.core_type<tc>, window_params = [{transform_indices = @transform_0, window_bounds = array<i64: 2, 512>}, {transform_indices = @transform_1, window_bounds = array<i64: 512, 128>}, {pipeline_mode = #tpu.pipeline_mode<synchronous>, transform_indices = @transform_2, window_bounds = array<i64: 1, 128>}, {pipeline_mode = #tpu.pipeline_mode<synchronous>, transform_indices = @transform_3, window_bounds = array<i64: 2, 128>}]} {
    %c0_i32 = arith.constant 0 : i32
    %0 = arith.cmpi eq, %arg0, %c0_i32 : i32
    %1 = arith.extui %0 : i1 to i32
    %c0_i32_0 = arith.constant 0 : i32
    %2 = arith.cmpi ne, %1, %c0_i32_0 : i32
    scf.if %2 {
      %cst_10 = arith.constant 0.000000e+00 : f32
      %12 = vector.broadcast %cst_10 : f32 to vector<2x128xf32>
      %c0_11 = arith.constant 0 : index
      %c0_12 = arith.constant 0 : index
      %13 = vector.load %arg5[%c0_11, %c0_12] : memref<2x128xf32, #tpu.memory_space<vmem>>, vector<2x128xf32>
      tpu.vector_store %arg5[%c0_11, %c0_12], %12 {strides = array<i32>} : memref<2x128xf32, #tpu.memory_space<vmem>>, vector<2x128xf32>,
    } else {
    }
    %c0 = arith.constant 0 : index
    %c0_1 = arith.constant 0 : index
    %3 = vector.load %arg5[%c0, %c0_1] : memref<2x128xf32, #tpu.memory_space<vmem>>, vector<2x128xf32>
    %c0_2 = arith.constant 0 : index
    %c0_3 = arith.constant 0 : index
    %4 = vector.load %arg1[%c0_2, %c0_3] : memref<2x512xbf16, #tpu.memory_space<vmem>>, vector<2x512xbf16>
    %c0_4 = arith.constant 0 : index
    %c0_5 = arith.constant 0 : index
    %5 = vector.load %arg2[%c0_4, %c0_5] : memref<512x128xbf16, #tpu.memory_space<vmem>>, vector<512x128xbf16>
    %cst = arith.constant dense<0.000000e+00> : vector<2x128xf32>
    %6 = tpu.matmul %4, %5, %cst {dimension_numbers = #tpu.dot_dimension_numbers<[1], [0], [0], [1], [0, 0, 1, 1], [], []>} : vector<2x512xbf16>, vector<512x128xbf16>, vector<2x128xf32> -> vector<2x128xf32>
    %7 = arith.addf %3, %6 : vector<2x128xf32>
    %c0_6 = arith.constant 0 : index
    %c0_7 = arith.constant 0 : index
    %8 = vector.load %arg5[%c0_6, %c0_7] : memref<2x128xf32, #tpu.memory_space<vmem>>, vector<2x128xf32>
    tpu.vector_store %arg5[%c0_6, %c0_7], %7 {strides = array<i32>} : memref<2x128xf32, #tpu.memory_space<vmem>>, vector<2x128xf32>,
    %c0_i32_8 = arith.constant 0 : i32
    %9 = arith.cmpi eq, %arg0, %c0_i32_8 : i32
    %10 = arith.extui %9 : i1 to i32
    %c0_i32_9 = arith.constant 0 : i32
    %11 = arith.cmpi ne, %10, %c0_i32_9 : i32
    scf.if %11 {
      %c0_10 = arith.constant 0 : index
      %c0_11 = arith.constant 0 : index
      %12 = vector.load %arg5[%c0_10, %c0_11] : memref<2x128xf32, #tpu.memory_space<vmem>>, vector<2x128xf32>
      %c0_12 = arith.constant 0 : index
      %c0_13 = arith.constant 0 : index
      %13 = vector.load %arg3[%c0_12, %c0_13] : memref<1x128xf32, #tpu.memory_space<vmem>>, vector<1x128xf32>
      %14 = vector.broadcast %13 : vector<1x128xf32> to vector<2x128xf32>
      %15 = arith.addf %12, %14 : vector<2x128xf32>
      %c0_14 = arith.constant 0 : index
      %c0_15 = arith.constant 0 : index
      %16 = vector.load %arg4[%c0_14, %c0_15] : memref<2x128xf32, #tpu.memory_space<vmem>>, vector<2x128xf32>
      tpu.vector_store %arg4[%c0_14, %c0_15], %15 {strides = array<i32>} : memref<2x128xf32, #tpu.memory_space<vmem>>, vector<2x128xf32>,
    } else {
    }
    return
  }
  func.func @transform_0(%arg0: i32) -> (i32, i32) {
    %c0_i32 = arith.constant 0 : i32
    %c0_i32_0 = arith.constant 0 : i32
    return %c0_i32, %arg0 : i32, i32
  }
  func.func @transform_1(%arg0: i32) -> (i32, i32) {
    %c0_i32 = arith.constant 0 : i32
    %c0_i32_0 = arith.constant 0 : i32
    return %arg0, %c0_i32 : i32, i32
  }
  func.func @transform_2(%arg0: i32) -> (i32, i32) {
    %c0_i32 = arith.constant 0 : i32
    %c0_i32_0 = arith.constant 0 : i32
    %c0_i32_1 = arith.constant 0 : i32
    return %c0_i32, %c0_i32_0 : i32, i32
  }
  func.func @transform_3(%arg0: i32) -> (i32, i32) {
    %c0_i32 = arith.constant 0 : i32
    %c0_i32_0 = arith.constant 0 : i32
    %c0_i32_1 = arith.constant 0 : i32
    return %c0_i32, %c0_i32_0 : i32, i32
  }
}

</mosaic_0001>

<bundles_post_ra>
// kernel: cnn_with_attention_forward.3
= control target key start
LH: loop header
LB: loop body
LE: loop exit
PB: predicated region body
PF: predicated region fallthrough
CT: control target
= control target key end

     0   :  { %vm76_vm0 = vcmask 1043456   ;;  %vm77_vm1 = vcmask 1044480   ;;  %v335_v1 = vmov 0   ;;  %v336_v2 = vmov 65535   ;;  %s411_s0 = inlined_call_operand.vmem [shape: bf16[1,25,512], index: 0, kind: input, shape index: {}]   ;;  %s412_s2 = inlined_call_operand.vmem [shape: f32[16,1], index: 2, kind: input, shape index: {}]   ;;  %s413_s1 = inlined_call_operand.vmem [shape: bf16[16,25], index: 1, kind: input, shape index: {}]   ;;  %s414_s4 = inlined_call_operand.vmem [shape: f32[8,1], index: 4, kind: input, shape index: {}]   ;;  %s415_s3 = inlined_call_operand.vmem [shape: bf16[8,16], index: 3, kind: input, shape index: {}]   ;;  %s416_s5 = inlined_call_operand.vmem [shape: bf16[16,128], index: 5, kind: output, shape index: {}]  }
   0x1   :  { %v318_v0 = vld [vmem:[%s411_s0 + $0x24] ss:$16 sps:$4 sm:$0x1f]   ;;  %124 = vmatprep.mubr.bf16.mxu0 %v335_v1  ;;  %167 = vmatprep.mubr.bf16.mxu1 %v335_v1  ;;  %v78_v3 = vsel %vm76_vm0, 4294967295, %v336_v2  ;;  %v326_v11 = vld [vmem:[%s411_s0 + $0xc] ss:$16 sps:$4 sm:$0xff]  }
   0x2   :  { %316 = vset.pattern.permute.xlu0 %v335_v1  ;;  %317 = vset.pattern.permute.xlu1 %v335_v1  ;;  %v79_v4 = vsel %vm77_vm1, %v78_v3, 0  ;;  %v320_v5 = vld [vmem:[%s411_s0 + $0x2c] ss:$16 sps:$4 sm:$0x1f]   ;;  %v324_v10 = vld [vmem:[%s411_s0 + $0x4] ss:$16 sps:$4 sm:$0xff]  }
   0x3   :  { %v84_v6 = vand.u32 %v318_v0, %v79_v4  ;;  %v322_v7 = vld [vmem:[%s411_s0 + $0x20] ss:$16 sps:$4 sm:$0x1f]   ;;  %v323_v8 = vld [vmem:[%s411_s0 + $0x28] ss:$16 sps:$4 sm:$0x1f]   ;;  %v90_v9 = vand.u32 %v320_v5, %v79_v4 }
   0x4   :  { %v81_v12 = vand.u32 %v322_v7, %v79_v4  ;;  %v87_v13 = vand.u32 %v323_v8, %v79_v4  ;;  %v184_v14 = vld [vmem:[%s412_s2] sm:$0xff]  ;;  %v329_v16 = vld [vmem:[%s411_s0 + $0x8] ss:$16 sps:$4 sm:$0xff]   ;;  %vm72_vm2 = vcmask 203776   ;;  %v337_v19 = vmov 0.0  }
   0x5   :  { %104 = vmatprep.subr.bf16.mxu0 %v84_v6  ;;  %147 = vmatprep.subr.bf16.mxu1 %v90_v9  ;;  %v328_v15 = vld [vmem:[%s411_s0] ss:$16 sps:$4 sm:$0xff]   ;;  %v185_v18 = vld [vmem:[%s412_s2 + $0x8] sm:$0xff]  ;;  %vm338_vm3 = vmmov 0   ;;  %vm202_vm4 = vcmask 130048  }
   0x6   :  { %105 = vmatpush1.bf16.msra.mxu0 %v81_v12  ;;  %148 = vmatpush1.bf16.msra.mxu1 %v87_v13  ;;  %v330_v17 = vld [vmem:[%s413_s1] sm:$0xff]  }
   0x7   :  { %106 = vmatprep.subr.bf16.mxu0 %v324_v10  ;;  %149 = vmatprep.subr.bf16.mxu1 %v326_v11  ;;  %v247_v20 = vld [vmem:[%s414_s4] sm:$0xff] }
   0x8   :  { %188 = vperm.xlu0 %316, %v184_v14   ;;  %250 = vperm.xlu1 %317, %v247_v20   ;;  %v200_v42 = vld [vmem:[%s415_s3] sm:$0xf] }
   0xa   :  { %107 = vmatpush1.bf16.msra.mxu0 %v328_v15  ;;  %150 = vmatpush1.bf16.msra.mxu1 %v329_v16 }
   0xb   :  { %306 = vmatprep.subr.bf16.mxu0 %v337_v19 }
   0xc   :  { %193 = vperm.xlu0 %316, %v185_v18  }
   0xd   :  { %291 = vmatmul.mubr.msk.bf16.vlgmr.msra.gmra.mxu0 %vm72_vm2, %v330_v17  ;;  %292 = vmatmul.mubr.msk.bf16.vlgmr.msra.gmra.mxu1 %vm72_vm2, %v330_v17 }
   0xe   :  { %308 = vmatprep.mubr.msk.bf16.mxu0 %vm338_vm3, %v337_v19 }
  0x83   :  { %v189_v25 = vpop.permute.xlu0 %188  ;;  %v251_v44 = vpop.permute.xlu1 %250 }
  0x87   :  { %v194_v37 = vpop.permute.xlu0 %193 }
  0xcd   :  { %v126_v21 = vpop.f32.mrf.mxu0  ;;  %v169_v22 = vpop.f32.mrf.mxu1 }
  0xcf   :  { %v128_v23 = vpop.f32.mrf.mxu0  ;;  %v171_v24 = vpop.f32.mrf.mxu1 }
  0xd0   :  { %v178_v26 = vmax.f32 %v126_v21, %v128_v23  ;;  %v180_v27 = vmax.f32 %v169_v22, %v171_v24 }
  0xd1   :  { %v130_v28 = vpop.f32.mrf.mxu0  ;;  %v173_v29 = vpop.f32.mrf.mxu1 }
  0xd2   :  { %v182_v30 = vmax.f32 %v178_v26, %v180_v27 }
  0xd3   :  { %v132_v31 = vpop.f32.mrf.mxu0  ;;  %v175_v32 = vpop.f32.mrf.mxu1 }
  0xd4   :  { %v179_v33 = vmax.f32 %v130_v28, %v132_v31  ;;  %v181_v34 = vmax.f32 %v173_v29, %v175_v32  ;;  %v196_v35 = vadd.f32 %v189_v25, %v182_v30 }
  0xd6   :  { %v183_v36 = vmax.f32 %v179_v33, %v181_v34  ;;  %v198_v39 = vmax.f32 %v196_v35, 0.0 }
  0xd8   :  { %v197_v38 = vadd.f32 %v194_v37, %v183_v36 }
  0xda   :  { %v199_v40 = vmax.f32 %v197_v38, 0.0 }
  0xdc   :  { %v201_v41 = vpack.c.bf16 %v199_v40, %v198_v39 }
  0xde   :  { %307 = vmatpush3.bf16.msra.mxu0 %v201_v41 }
  0xe1   :  { %309 = vmatmul.mubr.msk.bf16.vlgmr.msra.gmra.mxu0 %vm202_vm4, %v200_v42 }
 0x1a1   :  { %v240_v43 = vpop.f32.mrf.mxu0 }
 0x1a2   :  { %v246_v45 = vmax.f32 %v240_v43, 0.0 }
 0x1a3   :  { %v310_v46 = vpop.f32.mrf.mxu0 }
 0x1a4   :  { %v253_v47 = vmul.f32 %v251_v44, %v246_v45 }
 0x1a5   :  { %v243_v48 = vpop.f32.mrf.mxu0 }
 0x1a6   :  { %v254_v49 = vrot.slane %v253_v47, 4 }
 0x1a7   :  { %v311_v50 = vpop.f32.mrf.mxu0 }
 0x1a8   :  { %v255_v51 = vadd.f32 %v254_v49, %v253_v47 }
 0x1aa   :  { %v256_v52 = vrot.slane %v255_v51, 2 }
 0x1ac   :  { %v257_v53 = vadd.f32 %v256_v52, %v255_v51 }
 0x1ae   :  { %v258_v54 = vrot.slane %v257_v53, 1 }
 0x1b0   :  { %v259_v55 = vadd.f32 %v258_v54, %v257_v53 }
 0x1b2   :  { %v294_v56 = vmul.f32 -1.442695, %v259_v55 }
 0x1b4   :  { %331 = vpow2.f32 %v294_v56 }
 0x1c1   :  { %v332_v57 = vpop.eup %331 }
 0x1c2   :  { %v263_v58 = vadd.f32 1.0, %v332_v57 }
 0x1c4   :  { %333 = vrcp.f32 %v263_v58 }
 0x1d1   :  { %v334_v59 = vpop.eup %333 }
 0x1d2   :  { %v266_v60 = vmul.f32 %v334_v59, %v198_v39  ;;  %v267_v61 = vmul.f32 %v334_v59, %v199_v40 }
 0x1d4   :  { %v302_v62 = vpack.c.bf16 %v267_v61, %v266_v60 }
 0x1d6   :  { %303 = vst [vmem:[%s416_s5] sm:$0xff] %v302_v62  }

// kernel: cnn_with_attention_forward.4
= control target key start
LH: loop header
LB: loop body
LE: loop exit
PB: predicated region body
PF: predicated region fallthrough
CT: control target
= control target key end

     0   :  { %v674_v1 = vmov 0   ;;  %vm259_vm0 = vcmask 130048   ;;  %v675_v47 = vmov 0.0   ;;  %vm676_vm1 = vmmov 0   ;;  %s858_s0 = inlined_call_operand.vmem [shape: bf16[1,144,512], index: 0, kind: input, shape index: {}]   ;;  %s859_s1 = inlined_call_operand.vmem [shape: bf16[32,144], index: 1, kind: input, shape index: {}]   ;;  %s860_s2 = inlined_call_operand.vmem [shape: f32[32,1], index: 2, kind: input, shape index: {}]   ;;  %s861_s4 = inlined_call_operand.vmem [shape: f32[16,1], index: 4, kind: input, shape index: {}]   ;;  %s862_s3 = inlined_call_operand.vmem [shape: bf16[16,32], index: 3, kind: input, shape index: {}]   ;;  %s863_s5 = inlined_call_operand.vmem [shape: bf16[32,128], index: 5, kind: output, shape index: {}]  }
   0x1   :  { %v609_v0 = vld [vmem:[%s858_s0 + $0xe4] ss:$16 sps:$4 sm:$0xff]   ;;  %608 = vset.pattern.permute.xlu1 %v674_v1  ;;  %607 = vset.pattern.permute.xlu0 %v674_v1  ;;  %v611_v2 = vld [vmem:[%s858_s0 + $0xec] ss:$16 sps:$4 sm:$0xff]   ;;  %v613_v3 = vld [vmem:[%s858_s0 + $0xe0] ss:$16 sps:$4 sm:$0xff]  }
   0x2   :  { %266 = vmatprep.subr.bf16.mxu0 %v609_v0  ;;  %v614_v4 = vld [vmem:[%s858_s0 + $0xe8] ss:$16 sps:$4 sm:$0xff]   ;;  %319 = vmatprep.subr.bf16.mxu1 %v611_v2  ;;  %v615_v5 = vld [vmem:[%s858_s0 + $0xc4] ss:$16 sps:$4 sm:$0xff]   ;;  %v617_v6 = vld [vmem:[%s858_s0 + $0xcc] ss:$16 sps:$4 sm:$0xff]  }
   0x3   :  { %267 = vmatpush1.bf16.msra.mxu0 %v613_v3  ;;  %320 = vmatpush1.bf16.msra.mxu1 %v614_v4  ;;  %v619_v7 = vld [vmem:[%s858_s0 + $0xc0] ss:$16 sps:$4 sm:$0xff]   ;;  %v620_v8 = vld [vmem:[%s858_s0 + $0xc8] ss:$16 sps:$4 sm:$0xff]   ;;  %v621_v9 = vld [vmem:[%s858_s0 + $0xa4] ss:$16 sps:$4 sm:$0xff]  }
   0x4   :  { %268 = vmatprep.subr.bf16.mxu0 %v615_v5  ;;  %321 = vmatprep.subr.bf16.mxu1 %v617_v6  ;;  %v623_v10 = vld [vmem:[%s858_s0 + $0xac] ss:$16 sps:$4 sm:$0xff]   ;;  %v625_v11 = vld [vmem:[%s858_s0 + $0xa0] ss:$16 sps:$4 sm:$0xff]   ;;  %v626_v12 = vld [vmem:[%s858_s0 + $0xa8] ss:$16 sps:$4 sm:$0xff]  }
   0x5   :  { %v627_v13 = vld [vmem:[%s858_s0 + $0x84] ss:$16 sps:$4 sm:$0xff]   ;;  %v629_v14 = vld [vmem:[%s858_s0 + $0x8c] ss:$16 sps:$4 sm:$0xff]   ;;  %v631_v15 = vld [vmem:[%s858_s0 + $0x80] ss:$16 sps:$4 sm:$0xff]  }
   0x6   :  { %v632_v16 = vld [vmem:[%s858_s0 + $0x88] ss:$16 sps:$4 sm:$0xff]   ;;  %v633_v17 = vld [vmem:[%s858_s0 + $0x64] ss:$16 sps:$4 sm:$0xff]   ;;  %v635_v18 = vld [vmem:[%s858_s0 + $0x6c] ss:$16 sps:$4 sm:$0xff]  }
   0x7   :  { %269 = vmatpush1.bf16.msra.mxu0 %v619_v7  ;;  %322 = vmatpush1.bf16.msra.mxu1 %v620_v8  ;;  %v637_v19 = vld [vmem:[%s858_s0 + $0x60] ss:$16 sps:$4 sm:$0xff]   ;;  %v638_v20 = vld [vmem:[%s858_s0 + $0x68] ss:$16 sps:$4 sm:$0xff]   ;;  %v639_v21 = vld [vmem:[%s858_s0 + $0x44] ss:$16 sps:$4 sm:$0xff]  }
   0x8   :  { %270 = vmatprep.subr.bf16.mxu0 %v621_v9  ;;  %323 = vmatprep.subr.bf16.mxu1 %v623_v10  ;;  %v641_v22 = vld [vmem:[%s858_s0 + $0x4c] ss:$16 sps:$4 sm:$0xff]   ;;  %v643_v23 = vld [vmem:[%s858_s0 + $0x40] ss:$16 sps:$4 sm:$0xff]   ;;  %v644_v24 = vld [vmem:[%s858_s0 + $0x48] ss:$16 sps:$4 sm:$0xff]  }
   0x9   :  { %v645_v25 = vld [vmem:[%s858_s0 + $0x24] ss:$16 sps:$4 sm:$0xff]   ;;  %v647_v26 = vld [vmem:[%s858_s0 + $0x2c] ss:$16 sps:$4 sm:$0xff]   ;;  %v649_v27 = vld [vmem:[%s858_s0 + $0x20] ss:$16 sps:$4 sm:$0xff]  }
   0xa   :  { %v650_v28 = vld [vmem:[%s858_s0 + $0x28] ss:$16 sps:$4 sm:$0xff]   ;;  %v651_v29 = vld [vmem:[%s858_s0 + $0x4] ss:$16 sps:$4 sm:$0xff]   ;;  %v653_v30 = vld [vmem:[%s858_s0 + $0xc] ss:$16 sps:$4 sm:$0xff]  }
   0xb   :  { %271 = vmatpush1.bf16.msra.mxu0 %v625_v11  ;;  %324 = vmatpush1.bf16.msra.mxu1 %v626_v12  ;;  %v665_v31 = vld [vmem:[%s859_s1 + $0x4] ss:$8 sps:$4 sm:$0xff]   ;;  %v386_v32 = vld [vmem:[%s860_s2 + $0x10] sm:$0xff]  ;;  %v656_v35 = vld [vmem:[%s858_s0 + $0x8] ss:$16 sps:$4 sm:$0xff]   ;;  %vm425_vm2 = vcmask 261120  }
   0xc   :  { %272 = vmatprep.subr.bf16.mxu0 %v627_v13  ;;  %325 = vmatprep.subr.bf16.mxu1 %v629_v14  ;;  %v384_v33 = vld [vmem:[%s860_s2] sm:$0xff]  ;;  %v659_v37 = vld [vmem:[%s858_s0 + $0x10c] ss:$16 sps:$4 sm:$0xff]   ;;  %v662_v41 = vld [vmem:[%s858_s0 + $0x108] ss:$16 sps:$4 sm:$0xff]  }
   0xd   :  { %567 = vmatprep.mubr.msk.bf16.mxu0 %vm259_vm0, %v665_v31  ;;  %569 = vmatprep.mubr.msk.bf16.mxu1 %vm259_vm0, %v665_v31  ;;  %v655_v34 = vld [vmem:[%s858_s0] ss:$16 sps:$4 sm:$0xff]   ;;  %v657_v36 = vld [vmem:[%s858_s0 + $0x104] ss:$16 sps:$4 sm:$0xff]   ;;  %v387_v38 = vld [vmem:[%s860_s2 + $0x18] sm:$0xff] }
   0xe   :  { %400 = vperm.xlu0 %607, %v386_v32   ;;  %390 = vperm.xlu1 %608, %v384_v33   ;;  %v385_v39 = vld [vmem:[%s860_s2 + $0x8] sm:$0xff]  ;;  %v661_v40 = vld [vmem:[%s858_s0 + $0x100] ss:$16 sps:$4 sm:$0xff]   ;;  %v666_v45 = vld [vmem:[%s859_s1 + $0x14] ss:$8 sps:$4 sm:$0xff]  }
   0xf   :  { %273 = vmatpush1.bf16.msra.mxu0 %v631_v15  ;;  %326 = vmatpush1.bf16.msra.mxu1 %v632_v16  ;;  %v663_v42 = vld [vmem:[%s859_s1] ss:$8 sps:$4 sm:$0xff]   ;;  %v668_v46 = vld [vmem:[%s859_s1 + $0x10] ss:$8 sps:$4 sm:$0xff]  }
  0x10   :  { %274 = vmatprep.subr.bf16.mxu0 %v633_v17  ;;  %327 = vmatprep.subr.bf16.mxu1 %v635_v18  ;;  %v472_v43 = vld [vmem:[%s861_s4] sm:$0xff]  ;;  %v473_v44 = vld [vmem:[%s861_s4 + $0x8] sm:$0xff] }
  0x12   :  { %405 = vperm.xlu0 %607, %v387_v38   ;;  %395 = vperm.xlu1 %608, %v385_v39  }
  0x13   :  { %275 = vmatpush1.bf16.msra.mxu0 %v637_v19  ;;  %328 = vmatpush1.bf16.msra.mxu1 %v638_v20 }
  0x14   :  { %276 = vmatprep.subr.bf16.mxu0 %v639_v21  ;;  %329 = vmatprep.subr.bf16.mxu1 %v641_v22 }
  0x16   :  { %476 = vperm.xlu0 %607, %v472_v43   ;;  %481 = vperm.xlu1 %608, %v473_v44  }
  0x17   :  { %277 = vmatpush1.bf16.msra.mxu0 %v643_v23  ;;  %330 = vmatpush1.bf16.msra.mxu1 %v644_v24 }
  0x18   :  { %278 = vmatprep.subr.bf16.mxu0 %v645_v25  ;;  %331 = vmatprep.subr.bf16.mxu1 %v647_v26  ;;  %v669_v26 = vld [vmem:[%s862_s3] sm:$0xff]  }
  0x1b   :  { %279 = vmatpush1.bf16.msra.mxu0 %v649_v27  ;;  %332 = vmatpush1.bf16.msra.mxu1 %v650_v28 }
  0x1c   :  { %280 = vmatprep.subr.bf16.mxu0 %v651_v29  ;;  %333 = vmatprep.subr.bf16.mxu1 %v653_v30 }
  0x1f   :  { %281 = vmatpush1.bf16.msra.mxu0 %v655_v34  ;;  %334 = vmatpush1.bf16.msra.mxu1 %v656_v35 }
  0x20   :  { %296 = vmatprep.subr.bf16.mxu0 %v657_v36  ;;  %349 = vmatprep.subr.bf16.mxu1 %v659_v37 }
  0x23   :  { %297 = vmatpush2.bf16.msra.mxu0 %v661_v40  ;;  %350 = vmatpush2.bf16.msra.mxu1 %v662_v41 }
  0x24   :  { %596 = vmatprep.subr.bf16.mxu0 %v675_v47 }
  0x26   :  { %299 = vmatmul.mubr.bf16.vlgmr.msra.gmra.mxu0 %v663_v42  ;;  %352 = vmatmul.mubr.bf16.vlgmr.msra.gmra.mxu1 %v663_v42 }
  0x27   :  { %568 = vmatprep.mubr.msk.bf16.mxu0 %vm259_vm0, %v666_v45  ;;  %570 = vmatprep.mubr.msk.bf16.mxu1 %vm259_vm0, %v666_v45 }
  0x2e   :  { %309 = vmatmul.mubr.bf16.gmra.mxu0 %v668_v46  ;;  %362 = vmatmul.mubr.bf16.gmra.mxu1 %v668_v46 }
  0x2f   :  { %600 = vmatprep.mubr.msk.bf16.mxu0 %vm676_vm1, %v675_v47 }
  0x89   :  { %v391_v58 = vpop.permute.xlu1 %390  ;;  %v401_v61 = vpop.permute.xlu0 %400 }
  0x8d   :  { %v396_v12 = vpop.permute.xlu1 %395  ;;  %v406_v16 = vpop.permute.xlu0 %405 }
  0x91   :  { %v477_v31 = vpop.permute.xlu0 %476  ;;  %v482_v33 = vpop.permute.xlu1 %481 }
  0xe6   :  { %v300_v48 = vpop.f32.mrf.mxu0  ;;  %v353_v49 = vpop.f32.mrf.mxu1 }
  0xe8   :  { %v302_v50 = vpop.f32.mrf.mxu0  ;;  %v355_v51 = vpop.f32.mrf.mxu1 }
  0xe9   :  { %v372_v4 = vmax.f32 %v300_v48, %v302_v50  ;;  %v376_v5 = vmax.f32 %v353_v49, %v355_v51 }
  0xea   :  { %v304_v52 = vpop.f32.mrf.mxu0  ;;  %v357_v53 = vpop.f32.mrf.mxu1 }
  0xeb   :  { %v380_v13 = vmax.f32 %v372_v4, %v376_v5 }
  0xec   :  { %v306_v54 = vpop.f32.mrf.mxu0  ;;  %v359_v55 = vpop.f32.mrf.mxu1 }
  0xed   :  { %v373_v62 = vmax.f32 %v304_v52, %v306_v54  ;;  %v377_v63 = vmax.f32 %v357_v53, %v359_v55  ;;  %v408_v19 = vadd.f32 %v391_v58, %v380_v13 }
  0xee   :  { %v310_v56 = vpop.f32.mrf.mxu0  ;;  %v363_v57 = vpop.f32.mrf.mxu1 }
  0xef   :  { %v381_v9 = vmax.f32 %v373_v62, %v377_v63  ;;  %v412_v24 = vmax.f32 %v408_v19, 0.0 }
  0xf0   :  { %v312_v59 = vpop.f32.mrf.mxu0  ;;  %v365_v60 = vpop.f32.mrf.mxu1 }
  0xf1   :  { %v374_v0 = vmax.f32 %v310_v56, %v312_v59  ;;  %v378_v1 = vmax.f32 %v363_v57, %v365_v60  ;;  %v409_v17 = vadd.f32 %v396_v12, %v381_v9 }
  0xf2   :  { %v314_v2 = vpop.f32.mrf.mxu0  ;;  %v367_v3 = vpop.f32.mrf.mxu1 }
  0xf3   :  { %v382_v6 = vmax.f32 %v374_v0, %v378_v1  ;;  %v413_v22 = vmax.f32 %v409_v17, 0.0 }
  0xf4   :  { %v316_v7 = vpop.f32.mrf.mxu0  ;;  %v369_v8 = vpop.f32.mrf.mxu1 }
  0xf5   :  { %v375_v10 = vmax.f32 %v314_v2, %v316_v7  ;;  %v379_v11 = vmax.f32 %v367_v3, %v369_v8  ;;  %v410_v14 = vadd.f32 %v401_v61, %v382_v6  ;;  %v418_v25 = vpack.c.bf16 %v413_v22, %v412_v24 }
  0xf7   :  { %v383_v15 = vmax.f32 %v375_v10, %v379_v11  ;;  %v414_v20 = vmax.f32 %v410_v14, 0.0 }
  0xf9   :  { %v411_v18 = vadd.f32 %v406_v16, %v383_v15 }
  0xfb   :  { %v415_v21 = vmax.f32 %v411_v18, 0.0 }
  0xfd   :  { %v419_v23 = vpack.c.bf16 %v415_v21, %v414_v20 }
  0xff   :  { %597 = vmatpush3.bf16.msra.mxu0 %v419_v23 }
 0x100   :  { %598 = vmatprep.subr.bf16.mxu0 %v675_v47 }
 0x103   :  { %599 = vmatpush3.bf16.msra.mxu0 %v418_v25 }
 0x106   :  { %601 = vmatmul.mubr.msk.bf16.vlgmr.msra.gmra.mxu0 %vm425_vm2, %v669_v26 }
 0x1c6   :  { %v463_v27 = vpop.f32.mrf.mxu0 }
 0x1c7   :  { %v470_v29 = vmax.f32 %v463_v27, 0.0 }
 0x1c8   :  { %v602_v28 = vpop.f32.mrf.mxu0 }
 0x1c9   :  { %v484_v35 = vmul.f32 %v477_v31, %v470_v29 }
 0x1ca   :  { %v466_v30 = vpop.f32.mrf.mxu0 }
 0x1cb   :  { %v471_v32 = vmax.f32 %v466_v30, 0.0 }
 0x1cc   :  { %v603_v34 = vpop.f32.mrf.mxu0 }
 0x1cd   :  { %v485_v36 = vmul.f32 %v482_v33, %v471_v32 }
 0x1cf   :  { %v486_v37 = vadd.f32 %v485_v36, %v484_v35 }
 0x1d1   :  { %v487_v38 = vrot.slane %v486_v37, 4 }
 0x1d3   :  { %v488_v39 = vadd.f32 %v487_v38, %v486_v37 }
 0x1d5   :  { %v489_v40 = vrot.slane %v488_v39, 2 }
 0x1d7   :  { %v490_v41 = vadd.f32 %v489_v40, %v488_v39 }
 0x1d9   :  { %v491_v42 = vrot.slane %v490_v41, 1 }
 0x1db   :  { %v492_v43 = vadd.f32 %v491_v42, %v490_v41 }
 0x1dd   :  { %v573_v44 = vmul.f32 -1.442695, %v492_v43 }
 0x1df   :  { %670 = vpow2.f32 %v573_v44 }
 0x1ec   :  { %v671_v45 = vpop.eup %670 }
 0x1ed   :  { %v496_v46 = vadd.f32 1.0, %v671_v45 }
 0x1ef   :  { %672 = vrcp.f32 %v496_v46 }
 0x1fc   :  { %v673_v47 = vpop.eup %672 }
 0x1fd   :  { %v499_v48 = vmul.f32 %v673_v47, %v412_v24  ;;  %v500_v49 = vmul.f32 %v673_v47, %v413_v22  ;;  %v501_v50 = vmul.f32 %v673_v47, %v414_v20  ;;  %v502_v51 = vmul.f32 %v673_v47, %v415_v21 }
 0x1ff   :  { %v585_v52 = vpack.c.bf16 %v500_v49, %v499_v48  ;;  %v590_v53 = vpack.c.bf16 %v502_v51, %v501_v50 }
 0x201   :  { %586 = vst [vmem:[%s863_s5] sm:$0xff] %v585_v52   ;;  %592 = vst [vmem:[%s863_s5 + $0x8] sm:$0xff] %v590_v53  }

// kernel: cnn_with_attention_forward.5
= control target key start
LH: loop header
LB: loop body
LE: loop exit
PB: predicated region body
PF: predicated region fallthrough
CT: control target
= control target key end

     0   :  { %v99_v30 = vlaneseq  ;;  %v552_v34 = vmov 1966171168   ;;  %s680_s0 = inlined_call_operand.vmem [shape: bf16[2,512], index: 0, kind: input, shape index: {}]   ;;  %s681_s1 = inlined_call_operand.vmem [shape: bf16[512,128], index: 1, kind: input, shape index: {}]   ;;  %s682_s2 = inlined_call_operand.vmem [shape: f32[1,128], index: 2, kind: input, shape index: {}]   ;;  %s683_s3 = inlined_call_operand.hbm [shape: f32[2,128], index: 3, kind: output, shape index: {}]  }
   0x1   :  { %v498_v0 = vld [vmem:[%s681_s1 + $0x78] sm:$0xff]   ;;  %v502_v4 = vld [vmem:[%s681_s1 + $0x70] sm:$0xff]   ;;  %v506_v8 = vld [vmem:[%s681_s1 + $0x68] sm:$0xff]   ;;  %v97_v35 = vunpack.c.l.s4 %v552_v34 }
   0x2   :  { %v499_v1 = vld [vmem:[%s681_s1 + $0xf8] sm:$0xff]   ;;  %451 = vmatprep.subr.bf16.mxu0 %v498_v0  ;;  %v503_v5 = vld [vmem:[%s681_s1 + $0xf0] sm:$0xff]   ;;  %v507_v9 = vld [vmem:[%s681_s1 + $0xe8] sm:$0xff]   ;;  %v100_v36 = vshrl.u32 %v99_v30, 7 }
   0x3   :  { %v500_v2 = vld [vmem:[%s681_s1 + $0x38] sm:$0xff]   ;;  %473 = vmatprep.subr.bf16.mxu1 %v499_v1  ;;  %v504_v6 = vld [vmem:[%s681_s1 + $0x30] sm:$0xff]   ;;  %v508_v10 = vld [vmem:[%s681_s1 + $0x28] sm:$0xff]  }
   0x4   :  { %v501_v3 = vld [vmem:[%s681_s1 + $0xb8] sm:$0xff]   ;;  %452 = vmatpush3.bf16.msra.mxu0 %v500_v2  ;;  %v505_v7 = vld [vmem:[%s681_s1 + $0xb0] sm:$0xff]   ;;  %v509_v11 = vld [vmem:[%s681_s1 + $0xa8] sm:$0xff]  }
   0x5   :  { %474 = vmatpush3.bf16.msra.mxu1 %v501_v3  ;;  %453 = vmatprep.subr.bf16.mxu0 %v502_v4  ;;  %v510_v12 = vld [vmem:[%s681_s1 + $0x60] sm:$0xff]   ;;  %v514_v16 = vld [vmem:[%s681_s1 + $0x58] sm:$0xff]   ;;  %v518_v20 = vld [vmem:[%s681_s1 + $0x50] sm:$0xff]  }
   0x6   :  { %475 = vmatprep.subr.bf16.mxu1 %v503_v5  ;;  %v511_v13 = vld [vmem:[%s681_s1 + $0xe0] sm:$0xff]   ;;  %v515_v17 = vld [vmem:[%s681_s1 + $0xd8] sm:$0xff]   ;;  %v519_v21 = vld [vmem:[%s681_s1 + $0xd0] sm:$0xff]  }
   0x7   :  { %v512_v14 = vld [vmem:[%s681_s1 + $0x20] sm:$0xff]   ;;  %v516_v18 = vld [vmem:[%s681_s1 + $0x18] sm:$0xff]   ;;  %v520_v22 = vld [vmem:[%s681_s1 + $0x10] sm:$0xff]  }
   0x8   :  { %454 = vmatpush3.bf16.msra.mxu0 %v504_v6  ;;  %v513_v15 = vld [vmem:[%s681_s1 + $0xa0] sm:$0xff]   ;;  %v517_v19 = vld [vmem:[%s681_s1 + $0x98] sm:$0xff]   ;;  %v521_v23 = vld [vmem:[%s681_s1 + $0x90] sm:$0xff]  }
   0x9   :  { %476 = vmatpush3.bf16.msra.mxu1 %v505_v7  ;;  %455 = vmatprep.subr.bf16.mxu0 %v506_v8  ;;  %v522_v24 = vld [vmem:[%s681_s1 + $0x48] sm:$0xff]   ;;  %v526_v28 = vld [vmem:[%s681_s1 + $0x40] sm:$0xff]  }
   0xa   :  { %477 = vmatprep.subr.bf16.mxu1 %v507_v9  ;;  %v523_v25 = vld [vmem:[%s681_s1 + $0xc8] sm:$0xff]   ;;  %v527_v29 = vld [vmem:[%s681_s1 + $0xc0] sm:$0xff]  }
   0xb   :  { %v524_v26 = vld [vmem:[%s681_s1 + $0x8] sm:$0xff]   ;;  %v528_v31 = vld [vmem:[%s681_s1] sm:$0xff]  }
   0xc   :  { %456 = vmatpush3.bf16.msra.mxu0 %v508_v10  ;;  %v525_v27 = vld [vmem:[%s681_s1 + $0x88] sm:$0xff]   ;;  %v529_v32 = vld [vmem:[%s681_s1 + $0x80] sm:$0xff]  }
   0xd   :  { %478 = vmatpush3.bf16.msra.mxu1 %v509_v11  ;;  %457 = vmatprep.subr.bf16.mxu0 %v510_v12  ;;  %v417_v33 = vld.sshfl [vmem:[%s680_s0] sm:$0x33 pattern:$0x75316420] }
   0xe   :  { %479 = vmatprep.subr.bf16.mxu1 %v511_v13 }
  0x10   :  { %458 = vmatpush3.bf16.msra.mxu0 %v512_v14 }
  0x11   :  { %480 = vmatpush3.bf16.msra.mxu1 %v513_v15  ;;  %459 = vmatprep.subr.bf16.mxu0 %v514_v16 }
  0x12   :  { %481 = vmatprep.subr.bf16.mxu1 %v515_v17 }
  0x14   :  { %460 = vmatpush3.bf16.msra.mxu0 %v516_v18 }
  0x15   :  { %482 = vmatpush3.bf16.msra.mxu1 %v517_v19  ;;  %461 = vmatprep.subr.bf16.mxu0 %v518_v20 }
  0x16   :  { %483 = vmatprep.subr.bf16.mxu1 %v519_v21 }
  0x18   :  { %462 = vmatpush3.bf16.msra.mxu0 %v520_v22 }
  0x19   :  { %484 = vmatpush3.bf16.msra.mxu1 %v521_v23  ;;  %463 = vmatprep.subr.bf16.mxu0 %v522_v24 }
  0x1a   :  { %485 = vmatprep.subr.bf16.mxu1 %v523_v25 }
  0x1c   :  { %464 = vmatpush3.bf16.msra.mxu0 %v524_v26 }
  0x1d   :  { %486 = vmatpush3.bf16.msra.mxu1 %v525_v27  ;;  %465 = vmatprep.subr.bf16.mxu0 %v526_v28 }
  0x1e   :  { %487 = vmatprep.subr.bf16.mxu1 %v527_v29 }
  0x20   :  { %466 = vmatpush3.bf16.msra.mxu0 %v528_v31 }
  0x21   :  { %488 = vmatpush3.bf16.msra.mxu1 %v529_v32 }
  0x22   :  { %8 = vsyncpa [#allocation4], 0  ;;  %v95_v37 = vcombine.high %v417_v33, %v417_v33  ;;  %v98_v38 = vunpack.c.0.s8 %v97_v35  ;;  %v553_v44 = vmov 0.0   ;;  %v450_v58 = vld [vmem:[%s682_s2] ss:$0 sm:$0xff]  ;;  %s554_s24 = smov [#allocation3]  }
  0x23   :  { %20 = vst [vmem:[#allocation2] sm:$0x3] %v553_v44  ;;  %s409_s25 = sshll.u32 %s554_s24, 4  ;;  %s410_s25 = int_to_ptr.vmem [resolvable:$true] %s409_s25 }
  0x24   :  { %v101_v39 = vsub.s32 %v98_v38, %v100_v36  ;;  %s530_s26 = scalar_lea.vmem %s410_s25, 32  ;;  %p535_p1 = scmp.lt.s32.totalorder %s410_s25, %s410_s25 }
  0x25   :  { %p531_p0 = scmp.ne.s32.totalorder %s410_s25, %s530_s26  ;;  %p536_p2 = scmp.lt.s32.totalorder %s530_s26, %s530_s26 }
  0x26   :  { %v109_v40 = vrot.slane %v95_v37, %v101_v39  ;;  %v102_v41 = vrot.slane %v417_v33, %v101_v39 }
  0x27   :  { %p537_p3 = por %p536_p2, %p535_p1 }
  0x28   :  { %340 = vmatprep.mubr.bf16.mxu0 %v109_v40  ;;  %v111_v42 = vcombine.high %v109_v40, %v109_v40  ;;  %v110_v43 = vcombine.high %v102_v41, %v102_v41 }
  0x29   :  { %341 = vmatmul.mubr.bf16.vlgmr.msra.gmra.mxu0 %v102_v41  ;;  %p538_p4 = pnand %p537_p3, %p531_p0 }
  0x2a   :  { %380 = vmatprep.mubr.bf16.mxu1 %v111_v42  ;;  %v21_v52 = vld [vmem:[#allocation2] sm:$0x3] }
  0x2b   :  { %381 = vmatmul.mubr.bf16.vlgmr.msra.gmra.mxu1 %v110_v43 }
  0xe9   :  { %v467_v45 = vpop.f32.mrf.mxu0 }
  0xeb   :  { %v489_v46 = vpop.f32.mrf.mxu1  ;;  %v468_v47 = vpop.f32.mrf.mxu0 }
  0xec   :  { %v469_v48 = vadd.f32 %v468_v47, %v467_v45 }
  0xed   :  { %v490_v49 = vpop.f32.mrf.mxu1  ;;  %v470_v50 = vpop.f32.mrf.mxu0 }
  0xee   :  { %v491_v51 = vadd.f32 %v490_v49, %v489_v46 }
  0xef   :  { %v492_v53 = vpop.f32.mrf.mxu1  ;;  %v471_v54 = vpop.f32.mrf.mxu0 }
  0xf0   :  { %v383_v55 = vadd.f32 %v491_v51, %v469_v48 }
  0xf1   :  { %v493_v56 = vpop.f32.mrf.mxu1 }
  0xf2   :  { %v388_v57 = vadd.f32 %v383_v55, %v21_v52 }
  0xf4   :  { %389 = vst [vmem:[#allocation2] sm:$0x3] %v388_v57 }
  0xfb   :  { %v393_v59 = vld [vmem:[#allocation2] sm:$0x3] }
  0xfc   :  { %v401_v60 = vadd.f32 %v450_v58, %v393_v59 }
  0xfe   :  { %402 = vst [vmem:[#allocation3] sm:$0x3] %v401_v60 }
  0xff   :  { %541 = shalt.err (!%p538_p4)
}
 0x100   :  { %412 = dma.vmem_to_hbm [thread:$0]  %s410_s25, 32, %s683_s3, [#allocation4]  }
 0x101   :  { %550 = dma.done.wait [#allocation4], 32  }
 0x102   :  { %551 = vsyncadd [#allocation4], 4294967264 }
 0x103   :  { %416 = vsyncpa [#allocation4], 1 }

</bundles_post_ra>
